<compile_context>
chip_gen: v6e
topology: v6e:2x2x1
jax: 0.10.0
libtpu: 0.0.40
codegen_flags: <defaults>
</compile_context>

<pallas_src>
import jax
import jax.numpy as jnp
from jax.experimental import pallas as pl
from jax.experimental.pallas import tpu as pltpu

# Layer dims (torch: 784 -> 256 -> 128 -> 64 -> 10).
D_IN, D1, D2, D3, D_OUT = 784, 256, 128, 64, 10
# Feature dim padded to a multiple of 128 lanes for lane-dense loads.
D_IN_PAD = 896
# Max rows per grid step (fits comfortably in scoped VMEM on v5e/v6e/v7x).
MAX_TM = 512


def _round_up(x, m):
    return (x + m - 1) // m * m


def mlp_silu_kernel(x_ref,
                    w1_ref, b1_ref,
                    w2_ref, b2_ref,
                    w3_ref, b3_ref,
                    w4_ref, b4_ref,
                    o_ref):
    """One batch tile: 4 dense layers + SiLU + log_softmax, all in VMEM."""

    def dense(h, w_ref, b_ref):
        # bf16 x bf16 matmul with f32 accumulation; f32 bias add.
        return jnp.dot(h, w_ref[...],
                       preferred_element_type=jnp.float32) + b_ref[...]

    def silu(z):
        # jax.nn.sigmoid lowers to lax.logistic -> EUP slot (frees VALU).
        return z * jax.nn.sigmoid(z)

    h = x_ref[...]                                           # (tm, 896) bf16
    h = silu(dense(h, w1_ref, b1_ref)).astype(jnp.bfloat16)  # (tm, 256)
    h = silu(dense(h, w2_ref, b2_ref)).astype(jnp.bfloat16)  # (tm, 128)
    h = silu(dense(h, w3_ref, b3_ref)).astype(jnp.bfloat16)  # (tm, 64)
    logits = dense(h, w4_ref, b4_ref)                        # (tm, 10) f32

    # Numerically stable log_softmax over classes (dim=1).
    m = jnp.max(logits, axis=1, keepdims=True)
    shifted = logits - m
    lse = jnp.log(jnp.sum(jnp.exp(shifted), axis=1, keepdims=True))
    o_ref[...] = (shifted - lse).astype(o_ref.dtype)


@jax.jit
def classifier_silu_forward(x, params):
    """x: (N, C, H, W) or (N, 784). Returns (N, 10) f32 log-probabilities."""
    n = x.shape[0]
    x2d = x.reshape(n, -1)                 # torch: x.view(x.shape[0], -1)
    assert x2d.shape[1] == D_IN, f"expected {D_IN} features, got {x2d.shape[1]}"

    (w1, b1), (w2, b2), (w3, b3), (w4, b4) = params

    # bf16 inputs/weights; biases stay f32 (added to the f32 accumulator).
    x_bf = jnp.pad(x2d.astype(jnp.bfloat16), ((0, 0), (0, D_IN_PAD - D_IN)))
    w1p = jnp.pad(w1, ((0, D_IN_PAD - D_IN), (0, 0))).astype(jnp.bfloat16)
    w2b, w3b, w4b = (w.astype(jnp.bfloat16) for w in (w2, w3, w4))

    # Batch tiling: tm rows per grid step (multiple of 8 sublanes).
    tm = min(MAX_TM, _round_up(n, 8))
    n_pad = _round_up(n, tm)
    if n_pad != n:
        x_bf = jnp.pad(x_bf, ((0, n_pad - n), (0, 0)))
    grid = (n_pad // tm,)

    flops = 2 * n_pad * (D_IN * D1 + D1 * D2 + D2 * D3 + D3 * D_OUT)
    transcendentals = n_pad * (D1 + D2 + D3 + D_OUT)   # sigmoids + softmax exp
    bytes_accessed = (n_pad * D_IN_PAD * 2             # bf16 x read
                      + n_pad * D_OUT * 4              # f32 output write
                      + 2 * (D_IN_PAD * D1 + D1 * D2 + D2 * D3 + D3 * D_OUT)
                      + 4 * (D1 + D2 + D3 + D_OUT))    # weights + biases

    out = pl.pallas_call(
        mlp_silu_kernel,
        out_shape=jax.ShapeDtypeStruct((n_pad, D_OUT), jnp.float32),
        grid=grid,
        in_specs=[
            # x is streamed tile-by-tile (double-buffered by the pipeline).
            pl.BlockSpec((tm, D_IN_PAD), lambda i: (i, 0)),
            # Weights/biases: constant index_map -> fetched once, VMEM-resident.
            pl.BlockSpec((D_IN_PAD, D1), lambda i: (0, 0)),
            pl.BlockSpec((1, D1), lambda i: (0, 0)),
            pl.BlockSpec((D1, D2), lambda i: (0, 0)),
            pl.BlockSpec((1, D2), lambda i: (0, 0)),
            pl.BlockSpec((D2, D3), lambda i: (0, 0)),
            pl.BlockSpec((1, D3), lambda i: (0, 0)),
            pl.BlockSpec((D3, D_OUT), lambda i: (0, 0)),
            pl.BlockSpec((1, D_OUT), lambda i: (0, 0)),
        ],
        out_specs=pl.BlockSpec((tm, D_OUT), lambda i: (i, 0)),
        compiler_params=pltpu.CompilerParams(
            dimension_semantics=("parallel",)),        # megacore on v7x
        cost_estimate=pl.CostEstimate(
            flops=flops,
            transcendentals=transcendentals,
            bytes_accessed=bytes_accessed),
    )(x_bf, w1p, b1, w2b, b2, w3b, b3, w4b, b4)
    return out[:n]


def init_params(key):
    """Deterministic init mimicking torch nn.Linear (uniform +-1/sqrt(fan_in)).

    Weights stored as (in_features, out_features); biases as (1, out_features).
    """
    dims = [(D_IN, D1), (D1, D2), (D2, D3), (D3, D_OUT)]
    params = []
    for (fan_in, fan_out) in dims:
        key, kw, kb = jax.random.split(key, 3)
        bound = 1.0 / jnp.sqrt(jnp.float32(fan_in))
        w = jax.random.uniform(kw, (fan_in, fan_out), jnp.float32,
                               minval=-bound, maxval=bound)
        b = jax.random.uniform(kb, (1, fan_out), jnp.float32,
                               minval=-bound, maxval=bound)
        params.append((w, b))
    return params


def reference_forward(x, params):
    """Pure-JAX f32 reference for correctness checking."""
    h = x.reshape(x.shape[0], -1).astype(jnp.float32)
    (w1, b1), (w2, b2), (w3, b3), (w4, b4) = params
    act = lambda z: z * jax.nn.sigmoid(z)
    h = act(h @ w1 + b1)
    h = act(h @ w2 + b2)
    h = act(h @ w3 + b3)
    logits = h @ w4 + b4
    return jax.nn.log_softmax(logits, axis=1)


if __name__ == "__main__":
    key = jax.random.PRNGKey(0)
    key, kx = jax.random.split(key)

    # Small MNIST-like batch: (batch=2, channels=1, 28, 28) -> 784 features.
    x = jax.random.normal(kx, (2, 1, 28, 28), jnp.float32)
    params = init_params(key)

    out = jax.block_until_ready(classifier_silu_forward(x, params))
    ref = reference_forward(x, params)
    assert out.shape == (2, 10), out.shape
    max_err = float(jnp.max(jnp.abs(out - ref)))
    # bf16 inputs/weights (f32 accumulation) -> loosen tolerance vs f32 ref.
    assert max_err < 3e-2, f"max abs diff {max_err}"

    # Second check: batch not a multiple of the sublane tile (exercises
    # batch padding + output slicing).
    key, kx2 = jax.random.split(key)
    x2 = jax.random.normal(kx2, (20, 1, 28, 28), jnp.float32)
    out2 = jax.block_until_ready(classifier_silu_forward(x2, params))
    ref2 = reference_forward(x2, params)
    assert out2.shape == (20, 10), out2.shape
    max_err2 = float(jnp.max(jnp.abs(out2 - ref2)))
    assert max_err2 < 3e-2, f"max abs diff {max_err2}"

    print("KERNEL_OK")
</pallas_src>

<mosaic_0001>
module attributes {stable_mosaic.version = 11 : i64} {
  func.func @mlp_silu_kernel(%arg0: i32, %arg1: memref<8x896xbf16, #tpu.memory_space<vmem>>, %arg2: memref<896x256xbf16, #tpu.memory_space<vmem>>, %arg3: memref<1x256xf32, #tpu.memory_space<vmem>>, %arg4: memref<256x128xbf16, #tpu.memory_space<vmem>>, %arg5: memref<1x128xf32, #tpu.memory_space<vmem>>, %arg6: memref<128x64xbf16, #tpu.memory_space<vmem>>, %arg7: memref<1x64xf32, #tpu.memory_space<vmem>>, %arg8: memref<64x10xbf16, #tpu.memory_space<vmem>>, %arg9: memref<1x10xf32, #tpu.memory_space<vmem>>, %arg10: memref<8x10xf32, #tpu.memory_space<vmem>>) attributes {dimension_semantics = [#tpu.dimension_semantics<parallel>], iteration_bounds = array<i64: 1>, scalar_prefetch = 0 : i64, scratch_operands = 0 : i64, tpu.core_type = #tpu.core_type<tc>, window_params = [{transform_indices = @transform_0, window_bounds = array<i64: 8, 896>}, {pipeline_mode = #tpu.pipeline_mode<synchronous>, transform_indices = @transform_1, window_bounds = array<i64: 896, 256>}, {pipeline_mode = #tpu.pipeline_mode<synchronous>, transform_indices = @transform_2, window_bounds = array<i64: 1, 256>}, {pipeline_mode = #tpu.pipeline_mode<synchronous>, transform_indices = @transform_3, window_bounds = array<i64: 256, 128>}, {pipeline_mode = #tpu.pipeline_mode<synchronous>, transform_indices = @transform_4, window_bounds = array<i64: 1, 128>}, {pipeline_mode = #tpu.pipeline_mode<synchronous>, transform_indices = @transform_5, window_bounds = array<i64: 128, 64>}, {pipeline_mode = #tpu.pipeline_mode<synchronous>, transform_indices = @transform_6, window_bounds = array<i64: 1, 64>}, {pipeline_mode = #tpu.pipeline_mode<synchronous>, transform_indices = @transform_7, window_bounds = array<i64: 64, 10>}, {pipeline_mode = #tpu.pipeline_mode<synchronous>, transform_indices = @transform_8, window_bounds = array<i64: 1, 10>}, {transform_indices = @transform_9, window_bounds = array<i64: 8, 10>}]} {
    %c0 = arith.constant 0 : index
    %c0_0 = arith.constant 0 : index
    %0 = vector.load %arg1[%c0, %c0_0] : memref<8x896xbf16, #tpu.memory_space<vmem>>, vector<8x896xbf16>
    %c0_1 = arith.constant 0 : index
    %c0_2 = arith.constant 0 : index
    %1 = vector.load %arg2[%c0_1, %c0_2] : memref<896x256xbf16, #tpu.memory_space<vmem>>, vector<896x256xbf16>
    %cst = arith.constant dense<0.000000e+00> : vector<8x256xf32>
    %2 = tpu.matmul %0, %1, %cst {dimension_numbers = #tpu.dot_dimension_numbers<[1], [0], [0], [1], [0, 0, 1, 1], [], []>} : vector<8x896xbf16>, vector<896x256xbf16>, vector<8x256xf32> -> vector<8x256xf32>
    %c0_3 = arith.constant 0 : index
    %c0_4 = arith.constant 0 : index
    %3 = vector.load %arg3[%c0_3, %c0_4] : memref<1x256xf32, #tpu.memory_space<vmem>>, vector<1x256xf32>
    %4 = vector.broadcast %3 : vector<1x256xf32> to vector<8x256xf32>
    %5 = arith.addf %2, %4 : vector<8x256xf32>
    %6 = arith.negf %5 : vector<8x256xf32>
    %7 = math.exp %6 : vector<8x256xf32>
    %cst_5 = arith.constant 1.000000e+00 : f32
    %8 = vector.broadcast %cst_5 : f32 to vector<8x256xf32>
    %9 = arith.addf %8, %7 : vector<8x256xf32>
    %10 = arith.divf %8, %9 : vector<8x256xf32>
    %11 = arith.mulf %5, %10 : vector<8x256xf32>
    %12 = arith.truncf %11 : vector<8x256xf32> to vector<8x256xbf16>
    %c0_6 = arith.constant 0 : index
    %c0_7 = arith.constant 0 : index
    %13 = vector.load %arg4[%c0_6, %c0_7] : memref<256x128xbf16, #tpu.memory_space<vmem>>, vector<256x128xbf16>
    %cst_8 = arith.constant dense<0.000000e+00> : vector<8x128xf32>
    %14 = tpu.matmul %12, %13, %cst_8 {dimension_numbers = #tpu.dot_dimension_numbers<[1], [0], [0], [1], [0, 0, 1, 1], [], []>} : vector<8x256xbf16>, vector<256x128xbf16>, vector<8x128xf32> -> vector<8x128xf32>
    %c0_9 = arith.constant 0 : index
    %c0_10 = arith.constant 0 : index
    %15 = vector.load %arg5[%c0_9, %c0_10] : memref<1x128xf32, #tpu.memory_space<vmem>>, vector<1x128xf32>
    %16 = vector.broadcast %15 : vector<1x128xf32> to vector<8x128xf32>
    %17 = arith.addf %14, %16 : vector<8x128xf32>
    %18 = arith.negf %17 : vector<8x128xf32>
    %19 = math.exp %18 : vector<8x128xf32>
    %cst_11 = arith.constant 1.000000e+00 : f32
    %20 = vector.broadcast %cst_11 : f32 to vector<8x128xf32>
    %21 = arith.addf %20, %19 : vector<8x128xf32>
    %22 = arith.divf %20, %21 : vector<8x128xf32>
    %23 = arith.mulf %17, %22 : vector<8x128xf32>
    %24 = arith.truncf %23 : vector<8x128xf32> to vector<8x128xbf16>
    %c0_12 = arith.constant 0 : index
    %c0_13 = arith.constant 0 : index
    %25 = vector.load %arg6[%c0_12, %c0_13] : memref<128x64xbf16, #tpu.memory_space<vmem>>, vector<128x64xbf16>
    %cst_14 = arith.constant dense<0.000000e+00> : vector<8x64xf32>
    %26 = tpu.matmul %24, %25, %cst_14 {dimension_numbers = #tpu.dot_dimension_numbers<[1], [0], [0], [1], [0, 0, 1, 1], [], []>} : vector<8x128xbf16>, vector<128x64xbf16>, vector<8x64xf32> -> vector<8x64xf32>
    %c0_15 = arith.constant 0 : index
    %c0_16 = arith.constant 0 : index
    %27 = vector.load %arg7[%c0_15, %c0_16] : memref<1x64xf32, #tpu.memory_space<vmem>>, vector<1x64xf32>
    %28 = vector.broadcast %27 : vector<1x64xf32> to vector<8x64xf32>
    %29 = arith.addf %26, %28 : vector<8x64xf32>
    %30 = arith.negf %29 : vector<8x64xf32>
    %31 = math.exp %30 : vector<8x64xf32>
    %cst_17 = arith.constant 1.000000e+00 : f32
    %32 = vector.broadcast %cst_17 : f32 to vector<8x64xf32>
    %33 = arith.addf %32, %31 : vector<8x64xf32>
    %34 = arith.divf %32, %33 : vector<8x64xf32>
    %35 = arith.mulf %29, %34 : vector<8x64xf32>
    %36 = arith.truncf %35 : vector<8x64xf32> to vector<8x64xbf16>
    %c0_18 = arith.constant 0 : index
    %c0_19 = arith.constant 0 : index
    %37 = vector.load %arg8[%c0_18, %c0_19] : memref<64x10xbf16, #tpu.memory_space<vmem>>, vector<64x10xbf16>
    %cst_20 = arith.constant dense<0.000000e+00> : vector<8x10xf32>
    %38 = tpu.matmul %36, %37, %cst_20 {dimension_numbers = #tpu.dot_dimension_numbers<[1], [0], [0], [1], [0, 0, 1, 1], [], []>} : vector<8x64xbf16>, vector<64x10xbf16>, vector<8x10xf32> -> vector<8x10xf32>
    %c0_21 = arith.constant 0 : index
    %c0_22 = arith.constant 0 : index
    %39 = vector.load %arg9[%c0_21, %c0_22] : memref<1x10xf32, #tpu.memory_space<vmem>>, vector<1x10xf32>
    %40 = vector.broadcast %39 : vector<1x10xf32> to vector<8x10xf32>
    %41 = arith.addf %38, %40 : vector<8x10xf32>
    %cst_23 = arith.constant dense<0xFF800000> : vector<8xf32>
    %42 = vector.multi_reduction <maximumf>, %41, %cst_23 [1] : vector<8x10xf32> to vector<8xf32>
    %43 = vector.shape_cast %42 : vector<8xf32> to vector<8x1xf32>
    %44 = vector.broadcast %43 : vector<8x1xf32> to vector<8x10xf32>
    %45 = arith.subf %41, %44 : vector<8x10xf32>
    %46 = math.exp %45 : vector<8x10xf32>
    %cst_24 = arith.constant dense<0.000000e+00> : vector<8xf32>
    %47 = vector.multi_reduction <add>, %46, %cst_24 [1] : vector<8x10xf32> to vector<8xf32>
    %48 = vector.shape_cast %47 : vector<8xf32> to vector<8x1xf32>
    %49 = math.log %48 : vector<8x1xf32>
    %50 = vector.broadcast %49 : vector<8x1xf32> to vector<8x10xf32>
    %51 = arith.subf %45, %50 : vector<8x10xf32>
    %c0_25 = arith.constant 0 : index
    %c0_26 = arith.constant 0 : index
    %52 = vector.load %arg10[%c0_25, %c0_26] : memref<8x10xf32, #tpu.memory_space<vmem>>, vector<8x10xf32>
    tpu.vector_store %arg10[%c0_25, %c0_26], %51 {strides = array<i32>} : memref<8x10xf32, #tpu.memory_space<vmem>>, vector<8x10xf32>,
    return
  }
  func.func @transform_0(%arg0: i32) -> (i32, i32) {
    %c0_i32 = arith.constant 0 : i32
    %c0_i32_0 = arith.constant 0 : i32
    return %arg0, %c0_i32 : i32, i32
  }
  func.func @transform_1(%arg0: i32) -> (i32, i32) {
    %c0_i32 = arith.constant 0 : i32
    %c0_i32_0 = arith.constant 0 : i32
    %c0_i32_1 = arith.constant 0 : i32
    return %c0_i32, %c0_i32_0 : i32, i32
  }
  func.func @transform_2(%arg0: i32) -> (i32, i32) {
    %c0_i32 = arith.constant 0 : i32
    %c0_i32_0 = arith.constant 0 : i32
    %c0_i32_1 = arith.constant 0 : i32
    return %c0_i32, %c0_i32_0 : i32, i32
  }
  func.func @transform_3(%arg0: i32) -> (i32, i32) {
    %c0_i32 = arith.constant 0 : i32
    %c0_i32_0 = arith.constant 0 : i32
    %c0_i32_1 = arith.constant 0 : i32
    return %c0_i32, %c0_i32_0 : i32, i32
  }
  func.func @transform_4(%arg0: i32) -> (i32, i32) {
    %c0_i32 = arith.constant 0 : i32
    %c0_i32_0 = arith.constant 0 : i32
    %c0_i32_1 = arith.constant 0 : i32
    return %c0_i32, %c0_i32_0 : i32, i32
  }
  func.func @transform_5(%arg0: i32) -> (i32, i32) {
    %c0_i32 = arith.constant 0 : i32
    %c0_i32_0 = arith.constant 0 : i32
    %c0_i32_1 = arith.constant 0 : i32
    return %c0_i32, %c0_i32_0 : i32, i32
  }
  func.func @transform_6(%arg0: i32) -> (i32, i32) {
    %c0_i32 = arith.constant 0 : i32
    %c0_i32_0 = arith.constant 0 : i32
    %c0_i32_1 = arith.constant 0 : i32
    return %c0_i32, %c0_i32_0 : i32, i32
  }
  func.func @transform_7(%arg0: i32) -> (i32, i32) {
    %c0_i32 = arith.constant 0 : i32
    %c0_i32_0 = arith.constant 0 : i32
    %c0_i32_1 = arith.constant 0 : i32
    return %c0_i32, %c0_i32_0 : i32, i32
  }
  func.func @transform_8(%arg0: i32) -> (i32, i32) {
    %c0_i32 = arith.constant 0 : i32
    %c0_i32_0 = arith.constant 0 : i32
    %c0_i32_1 = arith.constant 0 : i32
    return %c0_i32, %c0_i32_0 : i32, i32
  }
  func.func @transform_9(%arg0: i32) -> (i32, i32) {
    %c0_i32 = arith.constant 0 : i32
    %c0_i32_0 = arith.constant 0 : i32
    return %arg0, %c0_i32 : i32, i32
  }
}

</mosaic_0001>

<bundles_post_ra>
// kernel: classifier_silu_forward.1
= control target key start
LH: loop header
LB: loop body
LE: loop exit
PB: predicated region body
PF: predicated region fallthrough
CT: control target
= control target key end

     0   :  { %vm1780_vm0 = vmmov 0   ;;  %vm1267_vm1 = vcmask 523264   ;;  %vm1311_vm2 = vcmask 80896   ;;  %s2287_s1 = inlined_call_operand.vmem [shape: bf16[896,256], index: 1, kind: input, shape index: {}]   ;;  %s2288_s0 = inlined_call_operand.vmem [shape: bf16[8,896], index: 0, kind: input, shape index: {}]   ;;  %s2289_s3 = inlined_call_operand.vmem [shape: bf16[256,128], index: 3, kind: input, shape index: {}]   ;;  %s2290_s2 = inlined_call_operand.vmem [shape: f32[1,256], index: 2, kind: input, shape index: {}]   ;;  %s2291_s5 = inlined_call_operand.vmem [shape: bf16[128,64], index: 5, kind: input, shape index: {}]   ;;  %s2292_s4 = inlined_call_operand.vmem [shape: f32[1,128], index: 4, kind: input, shape index: {}]   ;;  %s2293_s7 = inlined_call_operand.vmem [shape: bf16[64,10], index: 7, kind: input, shape index: {}]   ;;  %s2294_s6 = inlined_call_operand.vmem [shape: f32[1,64], index: 6, kind: input, shape index: {}]   ;;  %s2295_s8 = inlined_call_operand.vmem [shape: f32[1,10], index: 8, kind: input, shape index: {}]   ;;  %s2296_s9 = inlined_call_operand.vmem [shape: f32[8,10], index: 9, kind: output, shape index: {}]  }
   0x1   :  { %v1555_v0 = vld [vmem:[%s2287_s1 + $0x74] ss:$8 sps:$4 sm:$0xff]   ;;  %v1557_v1 = vld [vmem:[%s2287_s1 + $0x70] ss:$8 sps:$4 sm:$0xff]   ;;  %v1561_v4 = vld [vmem:[%s2287_s1 + $0x64] ss:$8 sps:$4 sm:$0xff]  }
   0x2   :  { %746 = vmatprep.subr.bf16.mxu0 %v1555_v0  ;;  %v1558_v2 = vld [vmem:[%s2287_s1 + $0x174] ss:$8 sps:$4 sm:$0xff]   ;;  %v1560_v3 = vld [vmem:[%s2287_s1 + $0x170] ss:$8 sps:$4 sm:$0xff]   ;;  %v1563_v5 = vld [vmem:[%s2287_s1 + $0x60] ss:$8 sps:$4 sm:$0xff]  }
   0x3   :  { %747 = vmatpush1.bf16.msra.mxu0 %v1557_v1  ;;  %787 = vmatprep.subr.bf16.mxu1 %v1558_v2  ;;  %v1564_v6 = vld [vmem:[%s2287_s1 + $0x164] ss:$8 sps:$4 sm:$0xff]   ;;  %v1566_v7 = vld [vmem:[%s2287_s1 + $0x160] ss:$8 sps:$4 sm:$0xff]   ;;  %v1567_v8 = vld [vmem:[%s2287_s1 + $0x54] ss:$8 sps:$4 sm:$0xff]  }
   0x4   :  { %788 = vmatpush1.bf16.msra.mxu1 %v1560_v3  ;;  %748 = vmatprep.subr.bf16.mxu0 %v1561_v4  ;;  %v1569_v9 = vld [vmem:[%s2287_s1 + $0x50] ss:$8 sps:$4 sm:$0xff]   ;;  %v1570_v10 = vld [vmem:[%s2287_s1 + $0x154] ss:$8 sps:$4 sm:$0xff]   ;;  %v1573_v11 = vld [vmem:[%s2287_s1 + $0x44] ss:$8 sps:$4 sm:$0xff]  }
   0x5   :  { %789 = vmatprep.subr.bf16.mxu1 %v1564_v6  ;;  %v1572_v12 = vld [vmem:[%s2287_s1 + $0x150] ss:$8 sps:$4 sm:$0xff]   ;;  %v1576_v13 = vld [vmem:[%s2287_s1 + $0x144] ss:$8 sps:$4 sm:$0xff]   ;;  %v1575_v14 = vld [vmem:[%s2287_s1 + $0x40] ss:$8 sps:$4 sm:$0xff]  }
   0x6   :  { %v1579_v15 = vld [vmem:[%s2287_s1 + $0x34] ss:$8 sps:$4 sm:$0xff]   ;;  %v1578_v16 = vld [vmem:[%s2287_s1 + $0x140] ss:$8 sps:$4 sm:$0xff]   ;;  %v1581_v18 = vld [vmem:[%s2287_s1 + $0x30] ss:$8 sps:$4 sm:$0xff]  }
   0x7   :  { %749 = vmatpush1.bf16.msra.mxu0 %v1563_v5  ;;  %v1582_v17 = vld [vmem:[%s2287_s1 + $0x134] ss:$8 sps:$4 sm:$0xff]   ;;  %v1585_v19 = vld [vmem:[%s2287_s1 + $0x24] ss:$8 sps:$4 sm:$0xff]   ;;  %v1584_v20 = vld [vmem:[%s2287_s1 + $0x130] ss:$8 sps:$4 sm:$0xff]  }
   0x8   :  { %750 = vmatprep.subr.bf16.mxu0 %v1567_v8  ;;  %790 = vmatpush1.bf16.msra.mxu1 %v1566_v7  ;;  %v1588_v21 = vld [vmem:[%s2287_s1 + $0x124] ss:$8 sps:$4 sm:$0xff]   ;;  %v1587_v22 = vld [vmem:[%s2287_s1 + $0x20] ss:$8 sps:$4 sm:$0xff]   ;;  %v1591_v23 = vld [vmem:[%s2287_s1 + $0x14] ss:$8 sps:$4 sm:$0xff]  }
   0x9   :  { %791 = vmatprep.subr.bf16.mxu1 %v1570_v10  ;;  %v1590_v24 = vld [vmem:[%s2287_s1 + $0x120] ss:$8 sps:$4 sm:$0xff]   ;;  %v1594_v25 = vld [vmem:[%s2287_s1 + $0x114] ss:$8 sps:$4 sm:$0xff]   ;;  %v1593_v26 = vld [vmem:[%s2287_s1 + $0x10] ss:$8 sps:$4 sm:$0xff]  }
   0xa   :  { %v1597_v27 = vld [vmem:[%s2287_s1 + $0x4] ss:$8 sps:$4 sm:$0xff]   ;;  %v1596_v28 = vld [vmem:[%s2287_s1 + $0x110] ss:$8 sps:$4 sm:$0xff]   ;;  %v1599_v30 = vld [vmem:[%s2287_s1] ss:$8 sps:$4 sm:$0xff]  }
   0xb   :  { %751 = vmatpush1.bf16.msra.mxu0 %v1569_v9  ;;  %v1600_v29 = vld [vmem:[%s2287_s1 + $0x104] ss:$8 sps:$4 sm:$0xff]   ;;  %v1603_v31 = vld [vmem:[%s2287_s1 + $0xf4] ss:$8 sps:$4 sm:$0xff]   ;;  %v1602_v32 = vld [vmem:[%s2287_s1 + $0x100] ss:$8 sps:$4 sm:$0xff]  }
   0xc   :  { %752 = vmatprep.subr.bf16.mxu0 %v1573_v11  ;;  %792 = vmatpush1.bf16.msra.mxu1 %v1572_v12  ;;  %v1606_v33 = vld [vmem:[%s2287_s1 + $0x1f4] ss:$8 sps:$4 sm:$0xff]   ;;  %v1605_v34 = vld [vmem:[%s2287_s1 + $0xf0] ss:$8 sps:$4 sm:$0xff]   ;;  %v1609_v35 = vld [vmem:[%s2287_s1 + $0xe4] ss:$8 sps:$4 sm:$0xff]  }
   0xd   :  { %793 = vmatprep.subr.bf16.mxu1 %v1576_v13  ;;  %v1608_v36 = vld [vmem:[%s2287_s1 + $0x1f0] ss:$8 sps:$4 sm:$0xff]   ;;  %v1612_v37 = vld [vmem:[%s2287_s1 + $0x1e4] ss:$8 sps:$4 sm:$0xff]   ;;  %v1611_v38 = vld [vmem:[%s2287_s1 + $0xe0] ss:$8 sps:$4 sm:$0xff]  }
   0xe   :  { %v1615_v39 = vld [vmem:[%s2287_s1 + $0xd4] ss:$8 sps:$4 sm:$0xff]   ;;  %v1614_v40 = vld [vmem:[%s2287_s1 + $0x1e0] ss:$8 sps:$4 sm:$0xff]   ;;  %v1617_v42 = vld [vmem:[%s2287_s1 + $0xd0] ss:$8 sps:$4 sm:$0xff]  }
   0xf   :  { %753 = vmatpush1.bf16.msra.mxu0 %v1575_v14  ;;  %v1618_v41 = vld [vmem:[%s2287_s1 + $0x1d4] ss:$8 sps:$4 sm:$0xff]   ;;  %v1621_v43 = vld [vmem:[%s2287_s1 + $0xc4] ss:$8 sps:$4 sm:$0xff]   ;;  %v1620_v44 = vld [vmem:[%s2287_s1 + $0x1d0] ss:$8 sps:$4 sm:$0xff]  }
  0x10   :  { %754 = vmatprep.subr.bf16.mxu0 %v1579_v15  ;;  %794 = vmatpush1.bf16.msra.mxu1 %v1578_v16  ;;  %v1624_v45 = vld [vmem:[%s2287_s1 + $0x1c4] ss:$8 sps:$4 sm:$0xff]   ;;  %v1623_v47 = vld [vmem:[%s2287_s1 + $0xc0] ss:$8 sps:$4 sm:$0xff]   ;;  %v1627_v49 = vld [vmem:[%s2287_s1 + $0xb4] ss:$8 sps:$4 sm:$0xff]  }
  0x11   :  { %795 = vmatprep.subr.bf16.mxu1 %v1582_v17  ;;  %v33_v46 = vld [vmem:[%s2288_s0] sm:$0xff]  ;;  %v34_v50 = vld [vmem:[%s2288_s0 + $0x8] sm:$0xff]  ;;  %v1630_v53 = vld [vmem:[%s2287_s1 + $0x1b4] ss:$8 sps:$4 sm:$0xff]   ;;  %v1778_v15 = vmov 0  }
  0x12   :  { %v1330_v48 = vcombine.high %v33_v46, %v33_v46  ;;  %v1626_v51 = vld [vmem:[%s2287_s1 + $0x1c0] ss:$8 sps:$4 sm:$0xff]   ;;  %v1332_v52 = vcombine.high %v34_v50, %v34_v50  ;;  %v1629_v54 = vld [vmem:[%s2287_s1 + $0xb0] ss:$8 sps:$4 sm:$0xff]   ;;  %v1633_v55 = vld [vmem:[%s2287_s1 + $0xa4] ss:$8 sps:$4 sm:$0xff]   ;;  %v1329_v5 = vcombine.low %v33_v46, %v33_v46  ;;  %v1331_v8 = vcombine.low %v34_v50, %v34_v50 }
  0x13   :  { %755 = vmatpush1.bf16.msra.mxu0 %v1581_v18  ;;  %v1632_v56 = vld [vmem:[%s2287_s1 + $0x1b0] ss:$8 sps:$4 sm:$0xff]   ;;  %v1636_v57 = vld [vmem:[%s2287_s1 + $0x1a4] ss:$8 sps:$4 sm:$0xff]   ;;  %v1635_v58 = vld [vmem:[%s2287_s1 + $0xa0] ss:$8 sps:$4 sm:$0xff]  }
  0x14   :  { %756 = vmatprep.subr.bf16.mxu0 %v1585_v19  ;;  %796 = vmatpush1.bf16.msra.mxu1 %v1584_v20  ;;  %v1639_v59 = vld [vmem:[%s2287_s1 + $0x94] ss:$8 sps:$4 sm:$0xff]   ;;  %v1638_v60 = vld [vmem:[%s2287_s1 + $0x1a0] ss:$8 sps:$4 sm:$0xff]   ;;  %v1641_v62 = vld [vmem:[%s2287_s1 + $0x90] ss:$8 sps:$4 sm:$0xff]  }
  0x15   :  { %797 = vmatprep.subr.bf16.mxu1 %v1588_v21  ;;  %778 = vmatprep.mubr.bf16.mxu0 %v1330_v48  ;;  %v1642_v61 = vld [vmem:[%s2287_s1 + $0x194] ss:$8 sps:$4 sm:$0xff]   ;;  %v1645_v63 = vld [vmem:[%s2287_s1 + $0x84] ss:$8 sps:$4 sm:$0xff]   ;;  %v1644_v0 = vld [vmem:[%s2287_s1 + $0x190] ss:$8 sps:$4 sm:$0xff]  }
  0x16   :  { %819 = vmatprep.mubr.bf16.mxu1 %v1332_v52  ;;  %v1648_v1 = vld [vmem:[%s2287_s1 + $0x184] ss:$8 sps:$4 sm:$0xff]   ;;  %v1647_v2 = vld [vmem:[%s2287_s1 + $0x80] ss:$8 sps:$4 sm:$0xff]   ;;  %v1655_v3 = vld [vmem:[%s2287_s1 + $0x274] ss:$8 sps:$4 sm:$0xff]  }
  0x17   :  { %757 = vmatpush1.bf16.msra.mxu0 %v1587_v22  ;;  %v1652_v4 = vld [vmem:[%s2287_s1 + $0x180] ss:$8 sps:$4 sm:$0xff]   ;;  %v1681_v6 = vld [vmem:[%s2287_s1 + $0x374] ss:$8 sps:$4 sm:$0xff]   ;;  %v1653_v7 = vld [vmem:[%s2287_s1 + $0x270] ss:$8 sps:$4 sm:$0xff]  }
  0x18   :  { %758 = vmatprep.subr.bf16.mxu0 %v1591_v23  ;;  %798 = vmatpush1.bf16.msra.mxu1 %v1590_v24  ;;  %v1660_v9 = vld [vmem:[%s2287_s1 + $0x264] ss:$8 sps:$4 sm:$0xff]   ;;  %v1679_v10 = vld [vmem:[%s2287_s1 + $0x370] ss:$8 sps:$4 sm:$0xff]   ;;  %v1658_v12 = vld [vmem:[%s2287_s1 + $0x260] ss:$8 sps:$4 sm:$0xff]  }
  0x19   :  { %799 = vmatprep.subr.bf16.mxu1 %v1594_v25  ;;  %v1687_v11 = vld [vmem:[%s2287_s1 + $0x364] ss:$8 sps:$4 sm:$0xff]   ;;  %v1663_v13 = vld [vmem:[%s2287_s1 + $0x254] ss:$8 sps:$4 sm:$0xff]   ;;  %v1685_v14 = vld [vmem:[%s2287_s1 + $0x360] ss:$8 sps:$4 sm:$0xff]  }
  0x1a   :  { %v1693_v16 = vld [vmem:[%s2287_s1 + $0x354] ss:$8 sps:$4 sm:$0xff]   ;;  %v1661_v17 = vld [vmem:[%s2287_s1 + $0x250] ss:$8 sps:$4 sm:$0xff]   ;;  %v1666_v18 = vld [vmem:[%s2287_s1 + $0x244] ss:$8 sps:$4 sm:$0xff]  }
  0x1b   :  { %759 = vmatpush1.bf16.msra.mxu0 %v1593_v26  ;;  %v1691_v19 = vld [vmem:[%s2287_s1 + $0x350] ss:$8 sps:$4 sm:$0xff]   ;;  %v1699_v20 = vld [vmem:[%s2287_s1 + $0x344] ss:$8 sps:$4 sm:$0xff]   ;;  %v1664_v21 = vld [vmem:[%s2287_s1 + $0x240] ss:$8 sps:$4 sm:$0xff]  }
  0x1c   :  { %760 = vmatprep.subr.bf16.mxu0 %v1597_v27  ;;  %800 = vmatpush1.bf16.msra.mxu1 %v1596_v28  ;;  %v1669_v22 = vld [vmem:[%s2287_s1 + $0x234] ss:$8 sps:$4 sm:$0xff]   ;;  %v1697_v24 = vld [vmem:[%s2287_s1 + $0x340] ss:$8 sps:$4 sm:$0xff]   ;;  %v1667_v27 = vld [vmem:[%s2287_s1 + $0x230] ss:$8 sps:$4 sm:$0xff]  }
  0x1d   :  { %801 = vmatprep.subr.bf16.mxu1 %v1600_v29  ;;  %v2080_v23 = vld [vmem:[%s2288_s0 + $0x10] sm:$0xff]  ;;  %v1672_v28 = vld [vmem:[%s2287_s1 + $0x224] ss:$8 sps:$4 sm:$0xff]  }
  0x1e   :  { %v1334_v25 = vcombine.high %v2080_v23, %v2080_v23  ;;  %v1705_v26 = vld [vmem:[%s2287_s1 + $0x334] ss:$8 sps:$4 sm:$0xff]   ;;  %v1703_v29 = vld [vmem:[%s2287_s1 + $0x330] ss:$8 sps:$4 sm:$0xff]   ;;  %v1702_v48 = vld [vmem:[%s2287_s1 + $0x2c4] ss:$8 sps:$4 sm:$0xff]  }
  0x1f   :  { %761 = vmatpush1.bf16.msra.mxu0 %v1599_v30  ;;  %v1711_v30 = vld [vmem:[%s2287_s1 + $0x324] ss:$8 sps:$4 sm:$0xff]   ;;  %v1696_v46 = vld [vmem:[%s2287_s1 + $0x2d4] ss:$8 sps:$4 sm:$0xff]  }
  0x20   :  { %762 = vmatprep.subr.bf16.mxu0 %v1603_v31  ;;  %802 = vmatpush1.bf16.msra.mxu1 %v1602_v32  ;;  %v1670_v31 = vld [vmem:[%s2287_s1 + $0x220] ss:$8 sps:$4 sm:$0xff]   ;;  %v1675_v32 = vld [vmem:[%s2287_s1 + $0x214] ss:$8 sps:$4 sm:$0xff]   ;;  %v1714_v52 = vld [vmem:[%s2287_s1 + $0x2a4] ss:$8 sps:$4 sm:$0xff]  }
  0x21   :  { %803 = vmatprep.subr.bf16.mxu1 %v1606_v33  ;;  %v1709_v33 = vld [vmem:[%s2287_s1 + $0x320] ss:$8 sps:$4 sm:$0xff]   ;;  %v1708_v50 = vld [vmem:[%s2287_s1 + $0x2b4] ss:$8 sps:$4 sm:$0xff]  }
  0x23   :  { %763 = vmatpush2.bf16.msra.mxu0 %v1605_v34  ;;  %v1717_v34 = vld [vmem:[%s2287_s1 + $0x314] ss:$8 sps:$4 sm:$0xff]  }
  0x24   :  { %764 = vmatprep.subr.bf16.mxu0 %v1609_v35  ;;  %804 = vmatpush2.bf16.msra.mxu1 %v1608_v36  ;;  %v1673_v35 = vld [vmem:[%s2287_s1 + $0x210] ss:$8 sps:$4 sm:$0xff]   ;;  %v1678_v36 = vld [vmem:[%s2287_s1 + $0x204] ss:$8 sps:$4 sm:$0xff]  }
  0x25   :  { %805 = vmatprep.subr.bf16.mxu1 %v1612_v37  ;;  %v1715_v37 = vld [vmem:[%s2287_s1 + $0x310] ss:$8 sps:$4 sm:$0xff]  }
  0x27   :  { %765 = vmatpush2.bf16.msra.mxu0 %v1611_v38  ;;  %v1723_v38 = vld [vmem:[%s2287_s1 + $0x304] ss:$8 sps:$4 sm:$0xff]  }
  0x28   :  { %766 = vmatprep.subr.bf16.mxu0 %v1615_v39  ;;  %806 = vmatpush2.bf16.msra.mxu1 %v1614_v40  ;;  %v1676_v39 = vld [vmem:[%s2287_s1 + $0x200] ss:$8 sps:$4 sm:$0xff]   ;;  %v1684_v40 = vld [vmem:[%s2287_s1 + $0x2f4] ss:$8 sps:$4 sm:$0xff]  }
  0x29   :  { %807 = vmatprep.subr.bf16.mxu1 %v1618_v41  ;;  %v1721_v41 = vld [vmem:[%s2287_s1 + $0x300] ss:$8 sps:$4 sm:$0xff]  }
  0x2b   :  { %767 = vmatpush2.bf16.msra.mxu0 %v1617_v42  ;;  %v1682_v42 = vld [vmem:[%s2287_s1 + $0x2f0] ss:$8 sps:$4 sm:$0xff]  }
  0x2c   :  { %768 = vmatprep.subr.bf16.mxu0 %v1621_v43  ;;  %808 = vmatpush2.bf16.msra.mxu1 %v1620_v44  ;;  %v1690_v43 = vld [vmem:[%s2287_s1 + $0x2e4] ss:$8 sps:$4 sm:$0xff]   ;;  %v1727_v44 = vld [vmem:[%s2288_s0 + $0x18] ss:$0 sps:$4 sm:$0xff]  }
  0x2d   :  { %809 = vmatprep.subr.bf16.mxu1 %v1624_v45  ;;  %v1688_v45 = vld [vmem:[%s2287_s1 + $0x2e0] ss:$8 sps:$4 sm:$0xff]  }
  0x2f   :  { %769 = vmatpush2.bf16.msra.mxu0 %v1623_v47  ;;  %v1694_v47 = vld [vmem:[%s2287_s1 + $0x2d0] ss:$8 sps:$4 sm:$0xff]  }
  0x30   :  { %770 = vmatprep.subr.bf16.mxu0 %v1627_v49  ;;  %810 = vmatpush2.bf16.msra.mxu1 %v1626_v51  ;;  %v1700_v49 = vld [vmem:[%s2287_s1 + $0x2c0] ss:$8 sps:$4 sm:$0xff]   ;;  %v1706_v51 = vld [vmem:[%s2287_s1 + $0x2b0] ss:$8 sps:$4 sm:$0xff]  }
  0x31   :  { %811 = vmatprep.subr.bf16.mxu1 %v1630_v53  ;;  %v1712_v53 = vld [vmem:[%s2287_s1 + $0x2a0] ss:$8 sps:$4 sm:$0xff]  }
  0x33   :  { %771 = vmatpush2.bf16.msra.mxu0 %v1629_v54  ;;  %v1720_v54 = vld [vmem:[%s2287_s1 + $0x294] ss:$8 sps:$4 sm:$0xff]  }
  0x34   :  { %772 = vmatprep.subr.bf16.mxu0 %v1633_v55  ;;  %812 = vmatpush2.bf16.msra.mxu1 %v1632_v56  ;;  %v1718_v55 = vld [vmem:[%s2287_s1 + $0x290] ss:$8 sps:$4 sm:$0xff]   ;;  %v1726_v56 = vld [vmem:[%s2287_s1 + $0x284] ss:$8 sps:$4 sm:$0xff]  }
  0x35   :  { %813 = vmatprep.subr.bf16.mxu1 %v1636_v57  ;;  %v1724_v57 = vld [vmem:[%s2287_s1 + $0x280] ss:$8 sps:$4 sm:$0xff]  }
  0x37   :  { %773 = vmatpush2.bf16.msra.mxu0 %v1635_v58  ;;  %v1333_v58 = vcombine.low %v2080_v23, %v2080_v23  ;;  %v151_v23 = vlaneseq }
  0x38   :  { %774 = vmatprep.subr.bf16.mxu0 %v1639_v59  ;;  %814 = vmatpush2.bf16.msra.mxu1 %v1638_v60  ;;  %v1730_v59 = vld [vmem:[%s2289_s3 + $0x78] sm:$0xff]  }
  0x39   :  { %815 = vmatprep.subr.bf16.mxu1 %v1642_v61  ;;  %v1731_v60 = vld [vmem:[%s2289_s3 + $0x38] sm:$0xff]   ;;  %v1732_v61 = vld [vmem:[%s2289_s3 + $0x70] sm:$0xff]  }
  0x3b   :  { %775 = vmatpush2.bf16.msra.mxu0 %v1641_v62  ;;  %v1733_v62 = vld [vmem:[%s2289_s3 + $0x30] sm:$0xff]  }
  0x3c   :  { %776 = vmatprep.subr.bf16.mxu0 %v1645_v63  ;;  %816 = vmatpush2.bf16.msra.mxu1 %v1644_v0  ;;  %v1734_v63 = vld [vmem:[%s2289_s3 + $0x68] sm:$0xff]  }
  0x3d   :  { %817 = vmatprep.subr.bf16.mxu1 %v1648_v1  ;;  %v1735_v0 = vld [vmem:[%s2289_s3 + $0x28] sm:$0xff]   ;;  %v1736_v1 = vld [vmem:[%s2289_s3 + $0x60] sm:$0xff]  }
  0x3f   :  { %777 = vmatpush2.bf16.msra.mxu0 %v1647_v2  ;;  %v1737_v2 = vld [vmem:[%s2289_s3 + $0x20] sm:$0xff]  }
  0x40   :  { %828 = vmatprep.subr.bf16.mxu0 %v1655_v3  ;;  %818 = vmatpush2.bf16.msra.mxu1 %v1652_v4  ;;  %v1738_v3 = vld [vmem:[%s2289_s3 + $0x58] sm:$0xff]  }
  0x41   :  { %869 = vmatprep.subr.bf16.mxu1 %v1681_v6  ;;  %v1739_v4 = vld [vmem:[%s2289_s3 + $0x18] sm:$0xff]   ;;  %v1741_v6 = vld [vmem:[%s2289_s3 + $0x10] sm:$0xff]  }
  0x42   :  { %779 = vmatmul.mubr.bf16.vlgmr.msra.gmra.mxu0 %v1329_v5  ;;  %v1740_v5 = vld [vmem:[%s2289_s3 + $0x50] sm:$0xff]  }
  0x43   :  { %829 = vmatpush1.bf16.msra.mxu0 %v1653_v7  ;;  %820 = vmatmul.mubr.bf16.vlgmr.msra.gmra.mxu1 %v1331_v8  ;;  %v1742_v7 = vld [vmem:[%s2289_s3 + $0x48] sm:$0xff]  }
  0x44   :  { %830 = vmatprep.subr.bf16.mxu0 %v1660_v9  ;;  %870 = vmatpush1.bf16.msra.mxu1 %v1679_v10  ;;  %v1743_v8 = vld [vmem:[%s2289_s3 + $0x8] sm:$0xff]   ;;  %v1744_v9 = vld [vmem:[%s2289_s3 + $0x40] sm:$0xff]  }
  0x45   :  { %901 = vmatprep.mubr.bf16.mxu1 %v1778_v15  ;;  %871 = vmatprep.subr.bf16.mxu1 %v1687_v11  ;;  %v1745_v10 = vld [vmem:[%s2289_s3] sm:$0xff]  }
  0x46   :  { %860 = vmatprep.mubr.bf16.mxu0 %v1334_v25 }
  0x47   :  { %831 = vmatpush1.bf16.msra.mxu0 %v1658_v12 }
  0x48   :  { %832 = vmatprep.subr.bf16.mxu0 %v1663_v13  ;;  %872 = vmatpush1.bf16.msra.mxu1 %v1685_v14 }
  0x49   :  { %873 = vmatprep.subr.bf16.mxu1 %v1693_v16 }
  0x4b   :  { %833 = vmatpush1.bf16.msra.mxu0 %v1661_v17 }
  0x4c   :  { %834 = vmatprep.subr.bf16.mxu0 %v1666_v18  ;;  %874 = vmatpush1.bf16.msra.mxu1 %v1691_v19 }
  0x4d   :  { %875 = vmatprep.subr.bf16.mxu1 %v1699_v20 }
  0x4f   :  { %835 = vmatpush1.bf16.msra.mxu0 %v1664_v21 }
  0x50   :  { %836 = vmatprep.subr.bf16.mxu0 %v1669_v22  ;;  %876 = vmatpush1.bf16.msra.mxu1 %v1697_v24  ;;  %v152_v24 = vshrl.u32 %v151_v23, 7 }
  0x51   :  { %877 = vmatprep.subr.bf16.mxu1 %v1705_v26  ;;  %v149_v26 = vld [vmem:[%s2290_s2] sm:$0x3] }
  0x52   :  { %v153_v25 = vsub.s32 0, %v152_v24 }
  0x53   :  { %837 = vmatpush1.bf16.msra.mxu0 %v1667_v27  ;;  %v157_v27 = vsub.s32 1, %v152_v24 }
  0x54   :  { %838 = vmatprep.subr.bf16.mxu0 %v1672_v28  ;;  %878 = vmatpush1.bf16.msra.mxu1 %v1703_v29  ;;  %v154_v28 = vrot.slane %v149_v26, %v153_v25 }
  0x55   :  { %879 = vmatprep.subr.bf16.mxu1 %v1711_v30  ;;  %v158_v29 = vrot.slane %v149_v26, %v157_v27 }
  0x57   :  { %839 = vmatpush1.bf16.msra.mxu0 %v1670_v31 }
  0x58   :  { %840 = vmatprep.subr.bf16.mxu0 %v1675_v32  ;;  %880 = vmatpush1.bf16.msra.mxu1 %v1709_v33 }
  0x59   :  { %881 = vmatprep.subr.bf16.mxu1 %v1717_v34 }
  0x5b   :  { %841 = vmatpush1.bf16.msra.mxu0 %v1673_v35 }
  0x5c   :  { %842 = vmatprep.subr.bf16.mxu0 %v1678_v36  ;;  %882 = vmatpush1.bf16.msra.mxu1 %v1715_v37 }
  0x5d   :  { %883 = vmatprep.subr.bf16.mxu1 %v1723_v38 }
  0x5f   :  { %843 = vmatpush1.bf16.msra.mxu0 %v1676_v39 }
  0x60   :  { %844 = vmatprep.subr.bf16.mxu0 %v1684_v40  ;;  %884 = vmatpush1.bf16.msra.mxu1 %v1721_v41 }
  0x61   :  { %1484 = vmatprep.subr.bf16.mxu1 %v1730_v59  ;;  %v1750_v59 = vld [vmem:[%s2291_s5 + $0x18] sm:$0xff]  }
  0x63   :  { %845 = vmatpush2.bf16.msra.mxu0 %v1682_v42  ;;  %902 = vmatmul.mubr.bf16.vlgmr.msra.gmra.mxu1 %v1727_v44 }
  0x64   :  { %846 = vmatprep.subr.bf16.mxu0 %v1690_v43  ;;  %1485 = vmatpush3.bf16.msra.mxu1 %v1731_v60  ;;  %v1751_v60 = vld [vmem:[%s2291_s5 + $0x10] sm:$0xff]  }
  0x65   :  { %1486 = vmatprep.subr.bf16.mxu1 %v1732_v61  ;;  %v1752_v61 = vld [vmem:[%s2291_s5 + $0x8] sm:$0xff]  }
  0x67   :  { %847 = vmatpush2.bf16.msra.mxu0 %v1688_v45 }
  0x68   :  { %848 = vmatprep.subr.bf16.mxu0 %v1696_v46  ;;  %1487 = vmatpush3.bf16.msra.mxu1 %v1733_v62  ;;  %v1753_v62 = vld [vmem:[%s2291_s5] sm:$0xff]  }
  0x69   :  { %1488 = vmatprep.subr.bf16.mxu1 %v1734_v63 }
  0x6b   :  { %849 = vmatpush2.bf16.msra.mxu0 %v1694_v47 }
  0x6c   :  { %850 = vmatprep.subr.bf16.mxu0 %v1702_v48  ;;  %1489 = vmatpush3.bf16.msra.mxu1 %v1735_v0  ;;  %v1450_v0 = vld [vmem:[%s2292_s4] ss:$0 sm:$0xff] }
  0x6d   :  { %1490 = vmatprep.subr.bf16.mxu1 %v1736_v1 }
  0x6f   :  { %851 = vmatpush2.bf16.msra.mxu0 %v1700_v49 }
  0x70   :  { %852 = vmatprep.subr.bf16.mxu0 %v1708_v50  ;;  %1491 = vmatpush3.bf16.msra.mxu1 %v1737_v2 }
  0x71   :  { %1492 = vmatprep.subr.bf16.mxu1 %v1738_v3 }
  0x73   :  { %853 = vmatpush2.bf16.msra.mxu0 %v1706_v51 }
  0x74   :  { %854 = vmatprep.subr.bf16.mxu0 %v1714_v52  ;;  %1493 = vmatpush3.bf16.msra.mxu1 %v1739_v4 }
  0x75   :  { %1494 = vmatprep.subr.bf16.mxu1 %v1740_v5 }
  0x77   :  { %855 = vmatpush2.bf16.msra.mxu0 %v1712_v53 }
  0x78   :  { %856 = vmatprep.subr.bf16.mxu0 %v1720_v54  ;;  %1495 = vmatpush3.bf16.msra.mxu1 %v1741_v6  ;;  %v1746_v54 = vld [vmem:[%s2291_s5 + $0x38] sm:$0xff]  }
  0x79   :  { %1496 = vmatprep.subr.bf16.mxu1 %v1742_v7 }
  0x7b   :  { %857 = vmatpush2.bf16.msra.mxu0 %v1718_v55  ;;  %v1779_v55 = vmov 0.0  }
  0x7c   :  { %858 = vmatprep.subr.bf16.mxu0 %v1726_v56  ;;  %1497 = vmatpush3.bf16.msra.mxu1 %v1743_v8  ;;  %v1747_v56 = vld [vmem:[%s2291_s5 + $0x30] sm:$0xff]  }
  0x7d   :  { %1498 = vmatprep.subr.bf16.mxu1 %v1744_v9 }
  0x7f   :  { %859 = vmatpush2.bf16.msra.mxu0 %v1724_v57  ;;  %v1748_v57 = vld [vmem:[%s2291_s5 + $0x28] sm:$0xff]  }
  0x80   :  { %1499 = vmatpush3.bf16.msra.mxu1 %v1745_v10  ;;  %1520 = vmatprep.subr.bf16.mxu0 %v1779_v55 }
  0x81   :  { %1540 = vmatprep.subr.bf16.mxu1 %v1779_v55 }
  0x82   :  { %861 = vmatmul.mubr.bf16.vlgmr.msra.gmra.mxu0 %v1333_v58  ;;  %v1749_v58 = vld [vmem:[%s2291_s5 + $0x20] sm:$0xff]  }
  0x83   :  { %1521 = vmatpush3.bf16.msra.mxu0 %v1746_v54  ;;  %1536 = vmatprep.mubr.msk.bf16.mxu0 %vm1780_vm0, %v1779_v55 }
  0x84   :  { %1522 = vmatprep.subr.bf16.mxu0 %v1779_v55 }
  0x87   :  { %1523 = vmatpush3.bf16.msra.mxu0 %v1747_v56 }
  0x88   :  { %1524 = vmatprep.subr.bf16.mxu0 %v1779_v55 }
  0x8b   :  { %1525 = vmatpush3.bf16.msra.mxu0 %v1748_v57 }
  0x8c   :  { %1526 = vmatprep.subr.bf16.mxu0 %v1779_v55 }
  0x8f   :  { %1527 = vmatpush3.bf16.msra.mxu0 %v1749_v58 }
  0x90   :  { %1528 = vmatprep.subr.bf16.mxu0 %v1779_v55 }
  0x93   :  { %1529 = vmatpush3.bf16.msra.mxu0 %v1750_v59 }
  0x94   :  { %1530 = vmatprep.subr.bf16.mxu0 %v1779_v55 }
  0x97   :  { %1531 = vmatpush3.bf16.msra.mxu0 %v1751_v60 }
  0x98   :  { %1532 = vmatprep.subr.bf16.mxu0 %v1779_v55 }
  0x9b   :  { %1533 = vmatpush3.bf16.msra.mxu0 %v1752_v61 }
  0x9c   :  { %1534 = vmatprep.subr.bf16.mxu0 %v1779_v55 }
  0x9f   :  { %1535 = vmatpush3.bf16.msra.mxu0 %v1753_v62 }
 0x102   :  { %v780_v11 = vpop.f32.mrf.mxu0 }
 0x103   :  { %v821_v13 = vpop.f32.mrf.mxu1  ;;  %v781_v30 = vadd.f32 %v780_v11, %v154_v28  ;;  %v1478_v28 = vld [vmem:[%s2295_s8] ss:$0 sm:$0xff] }
 0x104   :  { %v782_v12 = vpop.f32.mrf.mxu0 }
 0x105   :  { %v823_v15 = vpop.f32.mrf.mxu1  ;;  %v783_v31 = vadd.f32 %v782_v12, %v158_v29  ;;  %v822_v32 = vadd.f32 %v821_v13, %v781_v30  ;;  %v1754_v12 = vld [vmem:[%s2293_s7 + $0x18] sm:$0xff]   ;;  %v1755_v13 = vld [vmem:[%s2293_s7 + $0x10] sm:$0xff]  }
 0x106   :  { %v784_v14 = vpop.f32.mrf.mxu0 }
 0x107   :  { %v825_v17 = vpop.f32.mrf.mxu1  ;;  %v824_v34 = vadd.f32 %v823_v15, %v783_v31  ;;  %v1756_v14 = vld [vmem:[%s2293_s7 + $0x8] sm:$0xff]   ;;  %v1757_v15 = vld [vmem:[%s2293_s7] sm:$0xff]  }
 0x108   :  { %v785_v16 = vpop.f32.mrf.mxu0 }
 0x109   :  { %v826_v18 = vpop.f32.mrf.mxu1  ;;  %v1468_v16 = vld [vmem:[%s2294_s6] ss:$0 sm:$0xff] }
 0x123   :  { %v903_v19 = vpop.f32.mrf.mxu1 }
 0x125   :  { %v905_v20 = vpop.f32.mrf.mxu1 }
 0x127   :  { %v907_v21 = vpop.f32.mrf.mxu1 }
 0x129   :  { %v908_v22 = vpop.f32.mrf.mxu1 }
 0x142   :  { %v862_v33 = vpop.f32.mrf.mxu0 }
 0x143   :  { %v863_v35 = vadd.f32 %v862_v33, %v822_v32 }
 0x144   :  { %v864_v36 = vpop.f32.mrf.mxu0 }
 0x145   :  { %v904_v37 = vadd.f32 %v903_v19, %v863_v35  ;;  %v865_v38 = vadd.f32 %v864_v36, %v824_v34 }
 0x146   :  { %v866_v39 = vpop.f32.mrf.mxu0 }
 0x147   :  { %v1448_v40 = vmul.f32 -1.442695, %v904_v37  ;;  %v906_v41 = vadd.f32 %v905_v20, %v865_v38 }
 0x148   :  { %v867_v42 = vpop.f32.mrf.mxu0 }
 0x149   :  { %1758 = vpow2.f32 %v1448_v40  ;;  %v1449_v43 = vmul.f32 -1.442695, %v906_v41 }
 0x14b   :  { %1760 = vpow2.f32 %v1449_v43 }
 0x156   :  { %v1759_v44 = vpop.eup %1758 }
 0x157   :  { %v916_v45 = vadd.f32 1.0, %v1759_v44 }
 0x158   :  { %v1761_v46 = vpop.eup %1760 }
 0x159   :  { %1762 = vrcp.f32 %v916_v45  ;;  %v917_v47 = vadd.f32 1.0, %v1761_v46 }
 0x15b   :  { %1764 = vrcp.f32 %v917_v47 }
 0x166   :  { %v1763_v48 = vpop.eup %1762 }
 0x167   :  { %v922_v50 = vmul.f32 %v1763_v48, %v904_v37 }
 0x168   :  { %v1765_v49 = vpop.eup %1764 }
 0x169   :  { %v923_v51 = vmul.f32 %v1765_v49, %v906_v41  ;;  %v924_v53 = vpack.c.bf16 %v922_v50, %v922_v50 }
 0x16b   :  { %v925_v52 = vpack.c.bf16 %v923_v51, %v923_v51 }
 0x16d   :  { %1093 = vmatprep.mubr.bf16.mxu1 %v925_v52 }
 0x16e   :  { %1094 = vmatmul.mubr.bf16.vlgmr.msra.gmra.mxu1 %v924_v53 }
 0x16f   :  { %1548 = vmatprep.mubr.msk.bf16.mxu1 %vm1780_vm0, %v1779_v55  ;;  %1541 = vmatpush3.bf16.msra.mxu1 %v1754_v12 }
 0x170   :  { %1542 = vmatprep.subr.bf16.mxu1 %v1779_v55 }
 0x173   :  { %1543 = vmatpush3.bf16.msra.mxu1 %v1755_v13 }
 0x174   :  { %1544 = vmatprep.subr.bf16.mxu1 %v1779_v55 }
 0x177   :  { %1545 = vmatpush3.bf16.msra.mxu1 %v1756_v14 }
 0x178   :  { %1546 = vmatprep.subr.bf16.mxu1 %v1779_v55 }
 0x17b   :  { %1547 = vmatpush3.bf16.msra.mxu1 %v1757_v15 }
 0x22e   :  { %v1500_v63 = vpop.f32.mrf.mxu1 }
 0x230   :  { %v1501_v1 = vpop.f32.mrf.mxu1 }
 0x231   :  { %v1502_v2 = vadd.f32 %v1501_v1, %v1500_v63 }
 0x232   :  { %v1503_v3 = vpop.f32.mrf.mxu1 }
 0x233   :  { %v1096_v4 = vadd.f32 %v1502_v2, %v1450_v0 }
 0x234   :  { %v1504_v5 = vpop.f32.mrf.mxu1 }
 0x235   :  { %v1467_v6 = vmul.f32 -1.442695, %v1096_v4 }
 0x237   :  { %1766 = vpow2.f32 %v1467_v6 }
 0x244   :  { %v1767_v7 = vpop.eup %1766 }
 0x245   :  { %v1104_v8 = vadd.f32 1.0, %v1767_v7 }
 0x247   :  { %1768 = vrcp.f32 %v1104_v8 }
 0x254   :  { %v1769_v9 = vpop.eup %1768 }
 0x255   :  { %v1107_v10 = vmul.f32 %v1769_v9, %v1096_v4 }
 0x257   :  { %v1108_v11 = vpack.c.bf16 %v1107_v10, %v1107_v10 }
 0x259   :  { %1537 = vmatmul.mubr.bf16.vlgmr.msra.gmra.mxu0 %v1108_v11 }
 0x319   :  { %v1214_v17 = vpop.f32.mrf.mxu0 }
 0x31a   :  { %v1215_v18 = vadd.f32 %v1468_v16, %v1214_v17 }
 0x31b   :  { %v1538_v19 = vpop.f32.mrf.mxu0 }
 0x31c   :  { %v1477_v20 = vmul.f32 -1.442695, %v1215_v18 }
 0x31d   :  { %v1217_v21 = vpop.f32.mrf.mxu0 }
 0x31e   :  { %1770 = vpow2.f32 %v1477_v20 }
 0x31f   :  { %v1539_v22 = vpop.f32.mrf.mxu0 }
 0x32b   :  { %v1771_v23 = vpop.eup %1770 }
 0x32c   :  { %v1223_v24 = vadd.f32 1.0, %v1771_v23 }
 0x32e   :  { %1772 = vrcp.f32 %v1223_v24 }
 0x33b   :  { %v1773_v25 = vpop.eup %1772 }
 0x33c   :  { %v1226_v26 = vmul.f32 %v1773_v25, %v1215_v18 }
 0x33e   :  { %v1227_v27 = vpack.c.bf16 %v1226_v26, %v1226_v26 }
 0x340   :  { %1549 = vmatmul.mubr.msk.bf16.vlgmr.msra.gmra.mxu1 %vm1267_vm1, %v1227_v27 }
 0x400   :  { %v1305_v29 = vpop.f32.mrf.mxu1 }
 0x401   :  { %v1306_v30 = vadd.f32 %v1478_v28, %v1305_v29 }
 0x402   :  { %v1550_v31 = vpop.f32.mrf.mxu1 }
 0x403   :  { %v1312_v32 = vsel %vm1311_vm2, %v1306_v30, -inf }
 0x404   :  { %1313 = vmax.xlane.f32.xlu0 %v1312_v32  ;;  %v1308_v33 = vpop.f32.mrf.mxu1 }
 0x406   :  { %v1551_v34 = vpop.f32.mrf.mxu1 }
 0x48d   :  { %v1314_v35 = vpop.xlane.xlu0 %1313 }
 0x48e   :  { %v1315_v36 = vsub.f32 %v1306_v30, %v1314_v35 }
 0x490   :  { %v1316_v37 = vmul.f32 1.442695, %v1315_v36 }
 0x492   :  { %1774 = vpow2.f32 %v1316_v37 }
 0x49f   :  { %v1775_v38 = vpop.eup %1774 }
 0x4a0   :  { %v1318_v39 = vsel %vm1311_vm2, %v1775_v38, 0.0 }
 0x4a1   :  { %1319 = vadd.xlane.f32.xlu0 %v1318_v39 }
 0x52a   :  { %v1320_v40 = vpop.xlane.xlu0 %1319 }
 0x52b   :  { %1776 = vlog2.f32 %v1320_v40 }
 0x538   :  { %v1777_v41 = vpop.eup %1776 }
 0x539   :  { %v1322_v42 = vmul.f32 0.6931472, %v1777_v41 }
 0x53b   :  { %v1323_v43 = vsub.f32 %v1315_v36, %v1322_v42 }
 0x53d   :  { %1324 = vst.msk [vmem:[%s2296_s9] sm:$0xff] %vm1311_vm2, %v1323_v43 }

</bundles_post_ra>
